<compile_context>
chip_gen: v5e
topology: v5e:2x2
jax: 0.10.0
libtpu: 0.0.40
codegen_flags: <defaults>
</compile_context>

<pallas_src>
import functools

import jax
import jax.numpy as jnp
from jax.experimental import pallas as pl
from jax.experimental.pallas import tpu as pltpu  # noqa: F401  (imported for TPU backend)

N_EMBED = 64     # n_embed from the PyTorch script
HEAD_SIZE = 16   # head_size used for the example
MASK_VALUE = -1e30


def _head_kernel(x_ref, wqkv_ref, o_ref):
    # x_ref:    (B*T, C)  bf16  -- all batches, flattened
    # wqkv_ref: (C, 3H)   bf16  -- [Wq*scale | Wk | Wv], pre-transposed
    # o_ref:    (B, T, H) f32
    B, T, H = o_ref.shape

    x = x_ref[...]                                   # (B*T, C)
    w = wqkv_ref[...]                                # (C, 3H)

    # Single fused QKV projection on the MXU (scale already folded into Wq columns).
    qkv = jnp.dot(x, w, preferred_element_type=jnp.float32)      # (B*T, 3H) f32

    # Causal mask indices, shared across batch elements.
    row = jax.lax.broadcasted_iota(jnp.int32, (T, T), 0)
    col = jax.lax.broadcasted_iota(jnp.int32, (T, T), 1)
    causal = col <= row

    # Static unroll over the (small) batch dimension; each iteration is 2-D work.
    for b in range(B):
        qkv_b = qkv[b * T:(b + 1) * T]                            # (T, 3H)
        q = qkv_b[:, :H].astype(jnp.bfloat16)
        k = qkv_b[:, H:2 * H].astype(jnp.bfloat16)
        v = qkv_b[:, 2 * H:].astype(jnp.bfloat16)

        # scores = q @ k.T without materializing a transpose (contract on head dim).
        att = jax.lax.dot_general(
            q, k, (((1,), (1,)), ((), ())),
            preferred_element_type=jnp.float32)                   # (T, T) f32

        att = jnp.where(causal, att, MASK_VALUE)

        # Numerically stable softmax along the last axis (f32).
        att_max = jnp.max(att, axis=-1, keepdims=True)
        p = jnp.exp(att - att_max)
        denom = jnp.sum(p, axis=-1, keepdims=True)
        p = p * pl.reciprocal(denom, approx=True)                 # EUP divide

        out = jnp.dot(p.astype(jnp.bfloat16), v,
                      preferred_element_type=jnp.float32)         # (T, H)
        o_ref[b] = out.astype(o_ref.dtype)


def head_forward(x, wq, wk, wv):
    """x: (B, T, C) float32; wq/wk/wv: (H, C) float32 (PyTorch Linear layout).

    Returns (B, T, H) float32."""
    B, T, C = x.shape
    H = wq.shape[0]
    scale = C ** -0.5

    # Fuse weights: [Wq * scale | Wk | Wv], pre-transposed to (C, 3H) so the kernel
    # computes qkv = x @ W_qkv with no in-kernel transposes.
    w_qkv = jnp.concatenate([(wq * scale).T, wk.T, wv.T], axis=1)  # (C, 3H) f32

    x2d = x.reshape(B * T, C).astype(jnp.bfloat16)
    w_bf = w_qkv.astype(jnp.bfloat16)

    return pl.pallas_call(
        _head_kernel,
        out_shape=jax.ShapeDtypeStruct((B, T, H), jnp.float32),
        grid=(1,),
        in_specs=[
            pl.BlockSpec((B * T, C), lambda i: (0, 0)),       # fused x (all batches)
            pl.BlockSpec((C, 3 * H), lambda i: (0, 0)),       # fused, pre-scaled QKV weight
        ],
        out_specs=pl.BlockSpec((B, T, H), lambda i: (0, 0, 0)),
    )(x2d, w_bf)


def head_reference(x, wq, wk, wv):
    """Pure-JAX f32 reference mirroring the PyTorch forward."""
    B, T, C = x.shape
    q = x @ wq.T
    k = x @ wk.T
    v = x @ wv.T
    att = (q @ jnp.swapaxes(k, -2, -1)) * (C ** -0.5)
    mask = jnp.tril(jnp.ones((T, T), dtype=bool))
    att = jnp.where(mask, att, -jnp.inf)
    att = jax.nn.softmax(att, axis=-1)
    return att @ v


if __name__ == "__main__":
    key = jax.random.PRNGKey(0)
    kx, kq, kk, kv = jax.random.split(key, 4)

    B, T, C, H = 2, 8, N_EMBED, HEAD_SIZE

    x = jax.random.normal(kx, (B, T, C), dtype=jnp.float32)

    # Deterministic PyTorch-style Linear init: U(-1/sqrt(in), +1/sqrt(in)).
    bound = 1.0 / (C ** 0.5)
    wq = jax.random.uniform(kq, (H, C), jnp.float32, -bound, bound)
    wk = jax.random.uniform(kk, (H, C), jnp.float32, -bound, bound)
    wv = jax.random.uniform(kv, (H, C), jnp.float32, -bound, bound)

    out = head_forward(x, wq, wk, wv)
    out = jax.block_until_ready(out)

    ref = head_reference(x, wq, wk, wv)
    assert out.shape == (B, T, H), out.shape
    # bf16 MXU inputs + approx reciprocal -> loosened tolerance vs. the f32 reference.
    assert jnp.allclose(out, ref, atol=5e-2, rtol=5e-2), "mismatch vs reference"

    print("KERNEL_OK")
</pallas_src>

<mosaic_0001>
module attributes {stable_mosaic.version = 11 : i64} {
  func.func @_head_kernel(%arg0: i32, %arg1: memref<16x64xbf16, #tpu.memory_space<vmem>>, %arg2: memref<64x48xbf16, #tpu.memory_space<vmem>>, %arg3: memref<2x8x16xf32, #tpu.memory_space<vmem>>) attributes {dimension_semantics = [#tpu.dimension_semantics<arbitrary>], iteration_bounds = array<i64: 1>, scalar_prefetch = 0 : i64, scratch_operands = 0 : i64, tpu.core_type = #tpu.core_type<tc>, window_params = [{pipeline_mode = #tpu.pipeline_mode<synchronous>, transform_indices = @transform_0, window_bounds = array<i64: 16, 64>}, {pipeline_mode = #tpu.pipeline_mode<synchronous>, transform_indices = @transform_1, window_bounds = array<i64: 64, 48>}, {pipeline_mode = #tpu.pipeline_mode<synchronous>, transform_indices = @transform_2, window_bounds = array<i64: 2, 8, 16>}]} {
    %c0 = arith.constant 0 : index
    %c0_0 = arith.constant 0 : index
    %0 = vector.load %arg1[%c0, %c0_0] : memref<16x64xbf16, #tpu.memory_space<vmem>>, vector<16x64xbf16>
    %c0_1 = arith.constant 0 : index
    %c0_2 = arith.constant 0 : index
    %1 = vector.load %arg2[%c0_1, %c0_2] : memref<64x48xbf16, #tpu.memory_space<vmem>>, vector<64x48xbf16>
    %cst = arith.constant dense<0.000000e+00> : vector<16x48xf32>
    %2 = tpu.matmul %0, %1, %cst {dimension_numbers = #tpu.dot_dimension_numbers<[1], [0], [0], [1], [0, 0, 1, 1], [], []>} : vector<16x64xbf16>, vector<64x48xbf16>, vector<16x48xf32> -> vector<16x48xf32>
    %3 = tpu.iota {dimensions = array<i32: 0>} : vector<8x8xi32>
    %4 = tpu.iota {dimensions = array<i32: 1>} : vector<8x8xi32>
    %5 = arith.cmpi sle, %4, %3 : vector<8x8xi32>
    %6 = vector.extract_strided_slice %2 {offsets = [0, 0], sizes = [8, 48], strides = [1, 1]} : vector<16x48xf32> to vector<8x48xf32>
    %7 = vector.extract_strided_slice %6 {offsets = [0, 0], sizes = [8, 16], strides = [1, 1]} : vector<8x48xf32> to vector<8x16xf32>
    %8 = arith.truncf %7 : vector<8x16xf32> to vector<8x16xbf16>
    %9 = vector.extract_strided_slice %6 {offsets = [0, 16], sizes = [8, 16], strides = [1, 1]} : vector<8x48xf32> to vector<8x16xf32>
    %10 = arith.truncf %9 : vector<8x16xf32> to vector<8x16xbf16>
    %11 = vector.extract_strided_slice %6 {offsets = [0, 32], sizes = [8, 16], strides = [1, 1]} : vector<8x48xf32> to vector<8x16xf32>
    %12 = arith.truncf %11 : vector<8x16xf32> to vector<8x16xbf16>
    %cst_3 = arith.constant dense<0.000000e+00> : vector<8x8xf32>
    %13 = tpu.matmul %8, %10, %cst_3 {dimension_numbers = #tpu.dot_dimension_numbers<[1], [1], [0], [0], [0, 0, 1, 0], [], []>} : vector<8x16xbf16>, vector<8x16xbf16>, vector<8x8xf32> -> vector<8x8xf32>
    %cst_4 = arith.constant -1.000000e+30 : f32
    %14 = vector.broadcast %cst_4 : f32 to vector<8x8xf32>
    %15 = arith.select %5, %13, %14 : vector<8x8xi1>, vector<8x8xf32>
    %cst_5 = arith.constant dense<0xFF800000> : vector<8xf32>
    %16 = vector.multi_reduction <maximumf>, %15, %cst_5 [1] : vector<8x8xf32> to vector<8xf32>
    %17 = vector.shape_cast %16 : vector<8xf32> to vector<8x1xf32>
    %18 = vector.broadcast %17 : vector<8x1xf32> to vector<8x8xf32>
    %19 = arith.subf %15, %18 : vector<8x8xf32>
    %20 = math.exp %19 : vector<8x8xf32>
    %cst_6 = arith.constant dense<0.000000e+00> : vector<8xf32>
    %21 = vector.multi_reduction <add>, %20, %cst_6 [1] : vector<8x8xf32> to vector<8xf32>
    %22 = vector.shape_cast %21 : vector<8xf32> to vector<8x1xf32>
    %23 = tpu.reciprocal %22 {approx = true} : vector<8x1xf32> -> vector<8x1xf32>
    %24 = vector.broadcast %23 : vector<8x1xf32> to vector<8x8xf32>
    %25 = arith.mulf %20, %24 : vector<8x8xf32>
    %26 = arith.truncf %25 : vector<8x8xf32> to vector<8x8xbf16>
    %cst_7 = arith.constant dense<0.000000e+00> : vector<8x16xf32>
    %27 = tpu.matmul %26, %12, %cst_7 {dimension_numbers = #tpu.dot_dimension_numbers<[1], [0], [0], [1], [0, 0, 1, 1], [], []>} : vector<8x8xbf16>, vector<8x16xbf16>, vector<8x16xf32> -> vector<8x16xf32>
    %c0_8 = arith.constant 0 : index
    %c0_9 = arith.constant 0 : index
    %c0_10 = arith.constant 0 : index
    %28 = vector.load %arg3[%c0_8, %c0_9, %c0_10] : memref<2x8x16xf32, #tpu.memory_space<vmem>>, vector<1x8x16xf32>
    %29 = vector.shape_cast %28 : vector<1x8x16xf32> to vector<8x16xf32>
    %30 = vector.shape_cast %27 : vector<8x16xf32> to vector<1x8x16xf32>
    tpu.vector_store %arg3[%c0_8, %c0_9, %c0_10], %30 {strides = array<i32>} : memref<2x8x16xf32, #tpu.memory_space<vmem>>, vector<1x8x16xf32>,
    %31 = vector.extract_strided_slice %2 {offsets = [8, 0], sizes = [8, 48], strides = [1, 1]} : vector<16x48xf32> to vector<8x48xf32>
    %32 = vector.extract_strided_slice %31 {offsets = [0, 0], sizes = [8, 16], strides = [1, 1]} : vector<8x48xf32> to vector<8x16xf32>
    %33 = arith.truncf %32 : vector<8x16xf32> to vector<8x16xbf16>
    %34 = vector.extract_strided_slice %31 {offsets = [0, 16], sizes = [8, 16], strides = [1, 1]} : vector<8x48xf32> to vector<8x16xf32>
    %35 = arith.truncf %34 : vector<8x16xf32> to vector<8x16xbf16>
    %36 = vector.extract_strided_slice %31 {offsets = [0, 32], sizes = [8, 16], strides = [1, 1]} : vector<8x48xf32> to vector<8x16xf32>
    %37 = arith.truncf %36 : vector<8x16xf32> to vector<8x16xbf16>
    %cst_11 = arith.constant dense<0.000000e+00> : vector<8x8xf32>
    %38 = tpu.matmul %33, %35, %cst_11 {dimension_numbers = #tpu.dot_dimension_numbers<[1], [1], [0], [0], [0, 0, 1, 0], [], []>} : vector<8x16xbf16>, vector<8x16xbf16>, vector<8x8xf32> -> vector<8x8xf32>
    %cst_12 = arith.constant -1.000000e+30 : f32
    %39 = vector.broadcast %cst_12 : f32 to vector<8x8xf32>
    %40 = arith.select %5, %38, %39 : vector<8x8xi1>, vector<8x8xf32>
    %cst_13 = arith.constant dense<0xFF800000> : vector<8xf32>
    %41 = vector.multi_reduction <maximumf>, %40, %cst_13 [1] : vector<8x8xf32> to vector<8xf32>
    %42 = vector.shape_cast %41 : vector<8xf32> to vector<8x1xf32>
    %43 = vector.broadcast %42 : vector<8x1xf32> to vector<8x8xf32>
    %44 = arith.subf %40, %43 : vector<8x8xf32>
    %45 = math.exp %44 : vector<8x8xf32>
    %cst_14 = arith.constant dense<0.000000e+00> : vector<8xf32>
    %46 = vector.multi_reduction <add>, %45, %cst_14 [1] : vector<8x8xf32> to vector<8xf32>
    %47 = vector.shape_cast %46 : vector<8xf32> to vector<8x1xf32>
    %48 = tpu.reciprocal %47 {approx = true} : vector<8x1xf32> -> vector<8x1xf32>
    %49 = vector.broadcast %48 : vector<8x1xf32> to vector<8x8xf32>
    %50 = arith.mulf %45, %49 : vector<8x8xf32>
    %51 = arith.truncf %50 : vector<8x8xf32> to vector<8x8xbf16>
    %cst_15 = arith.constant dense<0.000000e+00> : vector<8x16xf32>
    %52 = tpu.matmul %51, %37, %cst_15 {dimension_numbers = #tpu.dot_dimension_numbers<[1], [0], [0], [1], [0, 0, 1, 1], [], []>} : vector<8x8xbf16>, vector<8x16xbf16>, vector<8x16xf32> -> vector<8x16xf32>
    %c1 = arith.constant 1 : index
    %c0_16 = arith.constant 0 : index
    %c0_17 = arith.constant 0 : index
    %53 = vector.load %arg3[%c1, %c0_16, %c0_17] : memref<2x8x16xf32, #tpu.memory_space<vmem>>, vector<1x8x16xf32>
    %54 = vector.shape_cast %53 : vector<1x8x16xf32> to vector<8x16xf32>
    %55 = vector.shape_cast %52 : vector<8x16xf32> to vector<1x8x16xf32>
    tpu.vector_store %arg3[%c1, %c0_16, %c0_17], %55 {strides = array<i32>} : memref<2x8x16xf32, #tpu.memory_space<vmem>>, vector<1x8x16xf32>,
    return
  }
  func.func @transform_0(%arg0: i32) -> (i32, i32) {
    %c0_i32 = arith.constant 0 : i32
    %c0_i32_0 = arith.constant 0 : i32
    %c0_i32_1 = arith.constant 0 : i32
    return %c0_i32, %c0_i32_0 : i32, i32
  }
  func.func @transform_1(%arg0: i32) -> (i32, i32) {
    %c0_i32 = arith.constant 0 : i32
    %c0_i32_0 = arith.constant 0 : i32
    %c0_i32_1 = arith.constant 0 : i32
    return %c0_i32, %c0_i32_0 : i32, i32
  }
  func.func @transform_2(%arg0: i32) -> (i32, i32, i32) {
    %c0_i32 = arith.constant 0 : i32
    %c0_i32_0 = arith.constant 0 : i32
    %c0_i32_1 = arith.constant 0 : i32
    %c0_i32_2 = arith.constant 0 : i32
    return %c0_i32, %c0_i32_0, %c0_i32_1 : i32, i32, i32
  }
}

</mosaic_0001>

<bundles_post_ra>
// kernel: tpu_custom_call.1
= control target key start
LH: loop header
LB: loop body
LE: loop exit
PB: predicated region body
PF: predicated region fallthrough
CT: control target
= control target key end

     0   :  { %s332_s0 = inlined_call_operand.vmem [shape: bf16[16,64], index: 0, kind: input, shape index: {}]   ;;  %s333_s1 = inlined_call_operand.vmem [shape: bf16[64,48], index: 1, kind: input, shape index: {}]   ;;  %s334_s2 = inlined_call_operand.hbm [shape: f32[2,8,16], index: 2, kind: output, shape index: {}]  }
   0x1   :  { %v242_v0 = vld [vmem:[%s333_s1 + $0x18] sm:$0xff] }
   0x2   :  { %7 = vsyncpa [#allocation3], 0  ;;  %60 = vmatpush.bf16.msra.mxu0 %v242_v0  ;;  %v241_v1 = vld [vmem:[%s333_s1 + $0x10] sm:$0xff]  ;;  %v240_v2 = vld [vmem:[%s333_s1 + $0x8] sm:$0xff]  ;;  %vm52_vm0 = vcmask 523264   ;;  %s282_s19 = smov 112   ;;  %v70_v13 = vlaneseq }
   0x3   :  { %v239_v3 = vld [vmem:[%s333_s1] sm:$0xff]  ;;  %vm79_vm1 = vcmask 130048   ;;  %vm100_vm3 = vcmask 64512   ;;  %vm118_vm4 = vcmask 1043456   ;;  %s284_s1 = smov [#allocation2]   ;;  %s201_s23 = sshll.u32 %s334_s2, 4  ;;  %s202_s23 = int_to_ptr.hbm [resolvable:$true] %s201_s23 }
   0x4   :  { %v238_v4 = vld [vmem:[%s332_s0] sm:$0xff]  ;;  %v71_v14 = vshrl.u32 %v70_v13, 7  ;;  %v73_v15 = vand.u32 127, %v70_v13  ;;  %s283_s0 = smov 96   ;;  %s199_s20 = sshll.u32 %s284_s1, 4  ;;  %s200_s20 = int_to_ptr.vmem [resolvable:$true] %s199_s20 }
   0x5   :  { %s285_s24 = smov 128   ;;  %s286_s25 = smov 8  }
   0x6   :  { %61 = vmatpush.bf16.msra.mxu0 %v241_v1  ;;  %vm74_vm2 = vcmp.le.s32.totalorder %v73_v15, %v71_v14 }
   0xa   :  { %62 = vmatpush.bf16.msra.mxu0 %v240_v2 }
   0xe   :  { %63 = vmatpush.bf16.msra.mxu0 %v239_v3 }
  0x11   :  { %233 = vmatmul.msk.bf16.vlgmr.msra.gmra.mxu0 %vm52_vm0, %v238_v4 }
  0x8e   :  { %v65_v5 = vpop.f32.mrf.mxu0 }
  0x8f   :  { %v75_v6 = vpack.c.bf16 %v65_v5, %v65_v5 }
  0x91   :  { %77 = vrot.lane.b32.xlu0 %v75_v6, %s282_s19 }
  0x96   :  { %v67_v7 = vpop.f32.mrf.mxu0 }
  0x97   :  { %v136_v8 = vpack.c.bf16 %v67_v7, %v67_v7 }
  0x99   :  { %138 = vrot.lane.b32.xlu0 %v136_v8, %s282_s19 }
 0x103   :  { %v78_v9 = vpop.permute.xlu0 %77 }
 0x104   :  { %v84_v10 = vsel %vm79_vm1, %v78_v9, 0 }
 0x105   :  { %93 = vmatpush.bf16.xpose.msra.mxu1 %v84_v10 }
 0x10b   :  { %v139_v11 = vpop.permute.xlu0 %138 }
 0x10c   :  { %234 = vmatmul.msk.bf16.vlgmr.msra.gmra.mxu1 %vm79_vm1, %v75_v6  ;;  %v144_v12 = vsel %vm79_vm1, %v139_v11, 0 }
 0x10d   :  { %153 = vmatpush.bf16.xpose.msra.mxu3 %v144_v12 }
 0x114   :  { %236 = vmatmul.msk.bf16.vlgmr.msra.gmra.mxu3 %vm79_vm1, %v136_v8 }
 0x189   :  { %v95_v16 = vpop.f32.mrf.mxu1 }
 0x18a   :  { %v99_v17 = vsel %vm74_vm2, %v95_v16, -1e+30 }
 0x18b   :  { %v101_v18 = vsel %vm100_vm3, %v99_v17, -inf }
 0x18c   :  { %102 = vmax.xlane.f32.xlu1 %v101_v18 }
 0x191   :  { %v97_v19 = vpop.f32.mrf.mxu1 }
 0x197   :  { %v155_v20 = vpop.f32.mrf.mxu3 }
 0x198   :  { %v159_v21 = vsel %vm74_vm2, %v155_v20, -1e+30 }
 0x199   :  { %v160_v22 = vsel %vm100_vm3, %v159_v21, -inf }
 0x19a   :  { %161 = vmax.xlane.f32.xlu1 %v160_v22 }
 0x19f   :  { %v157_v23 = vpop.f32.mrf.mxu3 }
 0x1b3   :  { %172 = vrot.lane.b32.xlu1 %v136_v8, %s283_s0 }
 0x1ff   :  { %v103_v24 = vpop.xlane.xlu1 %102 }
 0x200   :  { %v104_v25 = vsub.f32 %v99_v17, %v103_v24 }
 0x202   :  { %v105_v26 = vmul.f32 1.442695, %v104_v25 }
 0x204   :  { %248 = vpow2.f32 %v105_v26 }
 0x20a   :  { %v249_v27 = vpop.eup %248 }
 0x20b   :  { %v107_v28 = vsel %vm100_vm3, %v249_v27, 0.0 }
 0x20c   :  { %108 = vadd.xlane.f32.xlu2 %v107_v28 }
 0x20d   :  { %v162_v29 = vpop.xlane.xlu1 %161 }
 0x20e   :  { %v163_v30 = vsub.f32 %v159_v21, %v162_v29 }
 0x210   :  { %v164_v31 = vmul.f32 1.442695, %v163_v30 }
 0x212   :  { %250 = vpow2.f32 %v164_v31 }
 0x218   :  { %v251_v32 = vpop.eup %250 }
 0x219   :  { %v166_v33 = vsel %vm100_vm3, %v251_v32, 0.0 }
 0x21a   :  { %167 = vadd.xlane.f32.xlu0 %v166_v33 }
 0x224   :  { %113 = vrot.lane.b32.xlu2 %v75_v6, %s283_s0 }
 0x225   :  { %v173_v36 = vpop.permute.xlu1 %172 }
 0x226   :  { %v178_v40 = vsel %vm118_vm4, %v173_v36, 0 }
 0x27f   :  { %v109_v34 = vpop.xlane.xlu2 %108 }
 0x280   :  { %252 = vrcp.f32 %v109_v34 }
 0x286   :  { %v253_v35 = vpop.eup %252 }
 0x287   :  { %v114_v37 = vpop.permute.xlu2 %113  ;;  %v111_v38 = vmul.f32 %v253_v35, %v249_v27 }
 0x288   :  { %v120_v39 = vsel %vm118_vm4, %v114_v37, 0 }
 0x289   :  { %129 = vmatpush.bf16.msra.mxu2 %v120_v39  ;;  %v112_v41 = vpack.c.bf16 %v111_v38, %v111_v38 }
 0x28c   :  { %235 = vmatmul.msk.bf16.vlgmr.msra.gmra.mxu2 %vm100_vm3, %v112_v41 }
 0x28d   :  { %187 = vmatpush.bf16.msrb.mxu2 %v178_v40  ;;  %v168_v42 = vpop.xlane.xlu0 %167 }
 0x28e   :  { %254 = vrcp.f32 %v168_v42 }
 0x294   :  { %v255_v43 = vpop.eup %254 }
 0x295   :  { %v170_v44 = vmul.f32 %v255_v43, %v251_v32 }
 0x297   :  { %v171_v45 = vpack.c.bf16 %v170_v44, %v170_v44 }
 0x29c   :  { %237 = vmatmul.msk.bf16.vlgmr.msrb.gmra.mxu2 %vm100_vm3, %v171_v45 }
 0x30f   :  { %v131_v46 = vpop.f32.mrf.mxu2 }
 0x310   :  { %135 = vst.msk [vmem:[#allocation2] sm:$0xff] %vm79_vm1, %v131_v46 }
 0x317   :  { %v133_v47 = vpop.f32.mrf.mxu2 }
 0x31f   :  { %v189_v48 = vpop.f32.mrf.mxu2 }
 0x320   :  { %194 = vst.msk [vmem:[#allocation2 + $0x8] sm:$0xff] %vm79_vm1, %v189_v48 }
 0x321   :  { %207 = dma.vmem_to_hbm [thread:$0]  %s200_s20, 256, %s202_s23, [#allocation3], %s285_s24, %s285_s24, %s286_s25  }
 0x327   :  { %v191_v49 = vpop.f32.mrf.mxu2 }
 0x328   :  { %280 = dma.done.wait [#allocation3], 256  }
 0x329   :  { %281 = vsyncadd [#allocation3], 4294967040 }
 0x32a   :  { %212 = vsyncpa [#allocation3], 1 }

</bundles_post_ra>
